<compile_context>
chip_gen: v7x
topology: tpu7x:2x2x1
jax: 0.10.0
libtpu: 0.0.40
codegen_flags: <defaults>
</compile_context>

<pallas_src>
import jax
import jax.numpy as jnp
from jax.experimental import pallas as pl
from jax.experimental.pallas import tpu as pltpu


_LANE_CANDIDATES = (4096, 2048, 1024, 512, 256, 128)
_WHOLE_COPY_MAX_BYTES = 4 << 20  # small / oddly sized tensors: one full-extent block


def _identity_copy_kernel(x_ref, o_ref):
    # Hot path of BaseModel.inference(): forward == identity for the ABC.
    o_ref[...] = x_ref[...]


def _target_block_bytes() -> int:
    """Per-generation block size so the ~0.35us/grid-step overhead stays small."""
    try:
        kind = jax.devices()[0].device_kind.lower()
    except Exception:
        kind = ""
    if "v5" in kind and ("lite" in kind or "5e" in kind):
        return 2 << 20          # v5e (~0.82 TB/s HBM): 2 MiB already amortizes overhead
    if "v6" in kind:
        return 4 << 20          # v6e (~1.4 TB/s HBM)
    if "v7" in kind:
        return 8 << 20          # v7x (~3.2 TB/s HBM per TC): larger blocks pay off
    return 4 << 20              # unknown generation: safe middle ground


def _whole_array_copy(x):
    """Single full-extent block copy: no (8,128) divisibility / pad / slice needed."""
    total = x.size
    itemsize = jnp.dtype(x.dtype).itemsize
    x2d = x.reshape(1, total)
    out = pl.pallas_call(
        _identity_copy_kernel,
        out_shape=jax.ShapeDtypeStruct((1, total), x.dtype),
        cost_estimate=pl.CostEstimate(
            flops=0, transcendentals=0, bytes_accessed=2 * total * itemsize),
    )(x2d)
    return out.reshape(x.shape)


def _tiled_lane_dense_copy(x2d, logical_bytes):
    """Lane-dense (rows, lanes) pipelined copy; ragged last block, >=2 grid steps."""
    rows, lanes = x2d.shape
    itemsize = jnp.dtype(x2d.dtype).itemsize
    block_bytes = _target_block_bytes()
    max_block_rows = max(8, (block_bytes // (lanes * itemsize)) // 8 * 8)
    if rows <= 8:
        block_rows = rows  # full extent: allowed even if < 8
    else:
        # Cap so the grid has >=2 steps: dimension_semantics=("parallel",) can then
        # split the copy across both v7x TensorCores instead of leaving one idle.
        half_rows = max(8, (rows // 2) // 8 * 8)
        block_rows = min(max_block_rows, half_rows)
    grid = (pl.cdiv(rows, block_rows),)  # ragged last block: no row padding

    return pl.pallas_call(
        _identity_copy_kernel,
        out_shape=jax.ShapeDtypeStruct((rows, lanes), x2d.dtype),
        grid=grid,
        in_specs=[pl.BlockSpec((block_rows, lanes), lambda i: (i, 0))],
        out_specs=pl.BlockSpec((block_rows, lanes), lambda i: (i, 0)),
        compiler_params=pltpu.CompilerParams(
            dimension_semantics=("parallel",),
            # in + out blocks, each double-buffered (~4x block), plus headroom.
            vmem_limit_bytes=4 * block_bytes + (8 << 20),
        ),
        cost_estimate=pl.CostEstimate(
            flops=0, transcendentals=0, bytes_accessed=2 * logical_bytes),
    )(x2d)


@jax.jit
def base_model_forward(x: jax.Array) -> jax.Array:
    """BaseModel forward (identity contract) materialized via a Pallas copy."""
    total = x.size
    if total == 0:
        return x
    itemsize = jnp.dtype(x.dtype).itemsize

    lanes = next((l for l in _LANE_CANDIDATES if total % l == 0), None)
    if lanes is not None:
        # Lane-dense slab: unmasked full-lane vst, pipelined blocks.
        out2d = _tiled_lane_dense_copy(x.reshape(total // lanes, lanes),
                                       total * itemsize)
        return out2d.reshape(x.shape)

    if total * itemsize <= _WHOLE_COPY_MAX_BYTES:
        # Odd element count (not a multiple of 128): single full-extent block,
        # no wrapper-side jnp.pad / output slice.
        return _whole_array_copy(x)

    # TODO(synk): very large tensors with total % 128 != 0 still take a pad +
    #             slice round trip; an in-kernel masked tail store would remove
    #             it, but the BaseModel identity contract never hits this path.
    lanes = 128
    padded_total = pl.cdiv(total, lanes) * lanes
    flat = jnp.pad(x.reshape(-1), (0, padded_total - total))
    out2d = _tiled_lane_dense_copy(flat.reshape(padded_total // lanes, lanes),
                                   total * itemsize)
    return out2d.reshape(-1)[:total].reshape(x.shape)


class BaseModelJAX:
    """Host-side mirror of BaseModel's non-abstract functionality."""

    def __init__(self, use_pallas_copy: bool = False):
        self.best_loss = 1000000
        self.params = {}  # BaseModel.__init__ registers no nn.Parameters
        # Per perf review: the forward is semantically a no-op, so by default we
        # return the input with zero kernel launches / HBM traffic.  Set
        # use_pallas_copy=True to materialize the output through the Pallas
        # identity-copy kernel (fresh output buffer).
        self.use_pallas_copy = use_pallas_copy
        # TODO(synk): restore_checkpoint / save_checkpoint are torch.load/save
        #             host I/O with no Pallas equivalent; omitted.

    def forward(self, x):
        if not self.use_pallas_copy:
            return x  # identity contract: no kernel launch
        return base_model_forward(x)

    def test(self):
        # Abstract in PyTorch; realized here as a forward-propagation smoke test.
        return self.inference(jnp.zeros((2, 4, 16, 16), jnp.float32))

    def count_params(self):
        leaves = jax.tree_util.tree_leaves(self.params)
        num_total = sum(int(p.size) for p in leaves)
        num_trainable = num_total  # no frozen params
        return num_total, num_trainable

    def inference(self, input_tensor):
        # eval() / no_grad() / .cpu().detach() have no Pallas analogue.
        output = self.forward(input_tensor)
        if isinstance(output, tuple):
            output = output[0]
        return output


if __name__ == "__main__":
    key = jax.random.PRNGKey(0)

    # Default model: identity fast path, no kernel launch (perf-review item 1).
    model = BaseModelJAX()
    x = jax.random.normal(key, (2, 4, 16, 16), dtype=jnp.float32)
    y = jax.block_until_ready(model.inference(x))
    assert y.shape == x.shape and y.dtype == x.dtype
    assert bool(jnp.array_equal(y, x)), "identity fast path mismatch"

    # Pallas-materialized model: exercises the copy kernels on TPU.
    model_pallas = BaseModelJAX(use_pallas_copy=True)

    # (2,4,16,16): lane-dense slab, single-step grid.
    y_p = jax.block_until_ready(model_pallas.inference(x))
    assert y_p.shape == x.shape and y_p.dtype == x.dtype
    assert bool(jnp.array_equal(y_p, x)), "pallas identity mismatch"

    # Larger divisible tensor: multi-step grid with a ragged last block
    # (>=2 steps so the "parallel" axis can shard across both v7x TCs).
    x_big = jax.random.normal(key, (8, 128, 264), dtype=jnp.float32)
    y_big = jax.block_until_ready(model_pallas.inference(x_big))
    assert bool(jnp.array_equal(y_big, x_big)), "pallas identity mismatch (big)"

    # Odd element count (not a multiple of 128): whole-array single-block copy,
    # no wrapper-side pad / output slice.
    x_odd = jax.random.normal(key, (3, 5, 7, 11), dtype=jnp.float32)
    y_odd = jax.block_until_ready(model_pallas.inference(x_odd))
    assert y_odd.shape == x_odd.shape and y_odd.dtype == x_odd.dtype
    assert bool(jnp.array_equal(y_odd, x_odd)), "pallas identity mismatch (odd)"

    total, trainable = model.count_params()
    assert total == 0 and trainable == 0  # BaseModel registers no parameters

    print("KERNEL_OK")
</pallas_src>

<mosaic_0001>
module attributes {stable_mosaic.version = 11 : i64} {
  func.func @_identity_copy_kernel(%arg0: i32, %arg1: memref<1x2048xf32, #tpu.memory_space<vmem>>, %arg2: memref<1x2048xf32, #tpu.memory_space<vmem>>) attributes {dimension_semantics = [#tpu.dimension_semantics<parallel>], iteration_bounds = array<i64: 1>, scalar_prefetch = 0 : i64, scratch_operands = 0 : i64, tpu.core_type = #tpu.core_type<tc>, window_params = [{transform_indices = @transform_0, window_bounds = array<i64: 1, 2048>}, {transform_indices = @transform_1, window_bounds = array<i64: 1, 2048>}]} {
    %c0 = arith.constant 0 : index
    %c0_0 = arith.constant 0 : index
    %0 = vector.load %arg1[%c0, %c0_0] : memref<1x2048xf32, #tpu.memory_space<vmem>>, vector<1x2048xf32>
    %c0_1 = arith.constant 0 : index
    %c0_2 = arith.constant 0 : index
    %1 = vector.load %arg2[%c0_1, %c0_2] : memref<1x2048xf32, #tpu.memory_space<vmem>>, vector<1x2048xf32>
    tpu.vector_store %arg2[%c0_1, %c0_2], %0 {strides = array<i32>} : memref<1x2048xf32, #tpu.memory_space<vmem>>, vector<1x2048xf32>,
    return
  }
  func.func @transform_0(%arg0: i32) -> (i32, i32) {
    %c0_i32 = arith.constant 0 : i32
    %c0_i32_0 = arith.constant 0 : i32
    return %arg0, %c0_i32 : i32, i32
  }
  func.func @transform_1(%arg0: i32) -> (i32, i32) {
    %c0_i32 = arith.constant 0 : i32
    %c0_i32_0 = arith.constant 0 : i32
    return %arg0, %c0_i32 : i32, i32
  }
}

</mosaic_0001>

<bundles_post_ra>
// kernel: base_model_forward.1
= control target key start
LH: loop header
LB: loop body
LE: loop exit
PB: predicated region body
PF: predicated region fallthrough
CT: control target
= control target key end

     0   :  { %s38_s0 = inlined_call_operand.vmem [shape: f32[1,2048], index: 0, kind: input, shape index: {}]   ;;  %s39_s1 = inlined_call_operand.vmem [shape: f32[1,2048], index: 1, kind: output, shape index: {}]  }
   0x1   :  { %v8_v0 = vld [vmem:[%s38_s0] sm:$0xff]  ;;  %v9_v1 = vld [vmem:[%s38_s0 + $0x8] sm:$0xff] }
   0x2   :  { %10 = vst [vmem:[%s39_s1] sm:$0xff] %v8_v0  ;;  %11 = vst [vmem:[%s39_s1 + $0x8] sm:$0xff] %v9_v1 }

</bundles_post_ra>
